<compile_context>
chip_gen: v6e
topology: v6e:2x2x1
jax: 0.10.0
libtpu: 0.0.40
codegen_flags: <defaults>
</compile_context>

<pallas_src>
import functools

import jax
import jax.numpy as jnp
from jax.experimental import pallas as pl
from jax.experimental.pallas import tpu as pltpu


# Per-step VMEM working set (double-buffered inputs + f32 accumulator block) budget.
# Sized for the smallest-VMEM generation (v7x: 64 MiB physical / 32 MiB scoped default);
# v5e/v6e have 128 MiB physical so this is always safe.
_WS_BUDGET_BYTES = 24 << 20
_VMEM_LIMIT_CAP = 60 << 20  # never request more than (v7x physical - headroom)


def _static_int_pow(x, n):
    """x**n for a small static non-negative integer n, as a VALU multiply chain."""
    if n == 0:
        return jnp.ones_like(x)
    acc = x
    for _ in range(n - 1):
        acc = acc * x
    return acc


def _focal_kernel(x_ref, lab_ref, out_ref, *, alpha, gamma, epsilon, skip_first):
    """One (batch, spatial-outer, spatial-inner) grid step.

    x_ref   : (1, C, br, 128)   logits tile (native dtype; cast to f32 in-kernel)
    lab_ref : (1, br, 128)      int8/int32 class-label tile
    out_ref : (1, 1, br, 128)   lane-dense running accumulator (channel-summed term)
    """
    si = pl.program_id(2)

    @pl.when(si == 0)
    def _():
        out_ref[...] = jnp.zeros_like(out_ref)

    x = x_ref[0].astype(jnp.float32)    # (C, br, 128)
    lab = lab_ref[0].astype(jnp.int32)  # (br, 128)
    C = x.shape[0]

    # Softmax over channels == nn.Softmax(dim=1).  Channel is the leading (non-minor)
    # axis, so max/sum/normalize are per-vreg VPU ops, no XLU.
    m = jnp.max(x, axis=0, keepdims=True)
    e = jnp.exp(x - m)                  # (C, br, 128)
    denom = jnp.sum(e, axis=0)          # (br, 128)
    # Exact reciprocal keeps validation tight; flip to approx=True only if a bundle
    # dump shows EUP slack and the tolerance is relaxed deliberately.
    inv = pl.reciprocal(denom, approx=False)

    g = float(gamma)
    int_gamma = g >= 0.0 and g == int(g)

    # Static per-channel loop (C is small & static): live temporaries stay (br, 128)
    # wide and the one-hot / alpha coefficients come from scalar constants instead of
    # full-tile iota compares.  Channel 0 still feeds the softmax denominator; only its
    # loss term is skipped when skip_first is set.
    acc = None
    for c in range(C):
        if skip_first and c == 0:
            continue
        p_c = e[c] * inv                                     # (br, 128)
        t_c = lab == c
        # one-hot target => pt = select(t, p+eps, 1-p+eps), logpt = log(pt):
        # a single EUP log per element (vs. 2x log + 1x exp in the reference form).
        pt_c = jnp.where(t_c, p_c + epsilon, (1.0 - p_c) + epsilon)
        logpt_c = jnp.log(pt_c)
        a0 = (1.0 - alpha) if c == 0 else alpha              # softmax-normalization path
        coeff_c = jnp.where(t_c, a0, 1.0 - a0)
        one_m_pt = 1.0 - pt_c
        if int_gamma:
            focal_c = _static_int_pow(one_m_pt, int(g))      # gamma=2 -> one VALU mul
        else:
            # TODO(synk): non-integer gamma; clamp the base so pow (exp/log) can't NaN.
            focal_c = jnp.power(jnp.maximum(one_m_pt, 0.0), g)
        term_c = focal_c * (coeff_c * logpt_c)
        acc = term_c if acc is None else acc + term_c

    if acc is None:  # degenerate: C == 1 with skip_first
        acc = jnp.zeros(out_ref.shape[2:], jnp.float32)

    # Lane/sublane-dense accumulation; the tiny final reduction to a scalar happens
    # once in the JAX wrapper (no per-step XLU reduce, no narrow masked stores).
    out_ref[0, 0] += -acc


def _per_step_bytes(block_rows, nchan, x_bytes):
    # logits tile + int8 label tile + f32 accumulator block
    return block_rows * 128 * (nchan * x_bytes + 1 + 4)


def _pick_block_rows(rows, nchan, x_bytes, batch):
    """Largest row tile whose double-buffered working set fits the VMEM budget.

    Prefers multiples of 32 (native int8 sublane tile for the label stream) and keeps
    >= ~4 total grid steps so the BlockSpec pipeline still has work to prefetch.
    """
    cands = [c for c in (1024, 512, 256, 128, 64, 32) if c <= rows and rows % c == 0]
    fitting = [c for c in cands
               if 2 * _per_step_bytes(c, nchan, x_bytes) <= _WS_BUDGET_BYTES]
    for c in fitting:                       # descending
        if batch * (rows // c) >= 4:
            return c
    if fitting:
        return fitting[0]
    for c in (16, 8):
        if c <= rows and rows % c == 0:
            return c
    return rows                             # small/odd extents: full axis (always legal)


def focal_loss1(
    logits,
    target,
    *,
    gamma=2.0,
    alpha=0.75,
    epsilon=1e-5,
    loss_gain=1.0,
    skip_first_target=True,
    block_rows=None,
):
    """FocalLoss1.forward for NCDHW inputs (softmax normalization, weight=None)."""
    B, C, D, H, W = logits.shape
    S = D * H * W
    # TODO(synk): ragged spatial extents would need padding + masking of the mean.
    assert S % 128 == 0, "spatial extent must be a multiple of 128 lanes"
    rows = S // 128

    x_bytes = logits.dtype.itemsize
    if block_rows is None:
        block_rows = _pick_block_rows(rows, C, x_bytes, B)
    assert rows % block_rows == 0
    n_steps = rows // block_rows

    # Stream integer labels instead of a dense C-channel one-hot target; int8 when the
    # tile is compatible with the (32, 128) int8 sublane tiling (4x fewer label bytes).
    if target.ndim == logits.ndim:
        labels = jnp.argmax(target, axis=1)   # one-hot -> class indices
    else:
        labels = target
    use_i8 = (block_rows % 32 == 0) or (block_rows == rows)
    labels = labels.reshape(B, rows, 128).astype(jnp.int8 if use_i8 else jnp.int32)

    # Keep the logits' native dtype on the wire (bf16 streams at half the bytes;
    # the f32 upcast happens inside the kernel).
    x = logits.reshape(B, C, rows, 128)

    # Extra "parallel" spatial-outer axis so a 2-TensorCore chip (v7x) stays busy at
    # B == 1, only when each core still gets >= 2 pipeline steps.  On 1-TC parts the
    # cost is one extra (br,128) f32 block init/writeback (negligible).
    # TODO(synk): make the split explicit with CORE_PARALLEL / pl.core_map and gate it
    # off on single-TC parts once a reliable core-count query is plumbed through.
    s_outer = 2 if (B == 1 and n_steps % 2 == 0 and n_steps >= 4) else 1
    s_inner = n_steps // s_outer

    # Raise the scoped VMEM limit explicitly (v5e's default is only 16 MiB); cap well
    # below v7x's 64 MiB physical.
    per_step = _per_step_bytes(block_rows, C, x_bytes)
    vmem_limit = int(min(_VMEM_LIMIT_CAP, max(32 << 20, 2 * per_step + (8 << 20))))

    kernel = functools.partial(
        _focal_kernel,
        alpha=float(alpha),
        gamma=float(gamma),
        epsilon=float(epsilon),
        skip_first=bool(skip_first_target),
    )

    partial = pl.pallas_call(
        kernel,
        out_shape=jax.ShapeDtypeStruct((B, s_outer, block_rows, 128), jnp.float32),
        grid_spec=pltpu.PrefetchScalarGridSpec(
            num_scalar_prefetch=0,
            grid=(B, s_outer, s_inner),
            in_specs=[
                pl.BlockSpec(
                    (1, C, block_rows, 128),
                    lambda b, so, si: (b, 0, so * s_inner + si, 0),
                ),
                pl.BlockSpec(
                    (1, block_rows, 128),
                    lambda b, so, si: (b, so * s_inner + si, 0),
                ),
            ],
            out_specs=pl.BlockSpec(
                (1, 1, block_rows, 128),
                lambda b, so, si: (b, so, 0, 0),
            ),
        ),
        compiler_params=pltpu.CompilerParams(
            dimension_semantics=("parallel", "parallel", "arbitrary"),
            vmem_limit_bytes=vmem_limit,
        ),
    )(x, labels)  # (B, s_outer, block_rows, 128): lane-dense, channel-reduced partials

    # total = loss_gain * sum_{b, included c} mean_spatial(focal term) / B
    return loss_gain * (jnp.sum(partial) / (S * B))


def _reference_loss(logits, target, *, gamma, alpha, epsilon, loss_gain, skip_first):
    """Pure-JAX transcription of the PyTorch code (for validation)."""
    p = jax.nn.softmax(logits.astype(jnp.float32), axis=1)
    t = target.astype(jnp.float32)
    logpt = jnp.log(p + epsilon) * t + jnp.log(1.0 - p + epsilon) * (1.0 - t)
    pt = jnp.exp(logpt)
    C = logits.shape[1]
    alpha0 = jnp.where(jnp.arange(C) == 0, 1.0 - alpha, alpha).reshape(1, C, 1, 1, 1)
    weighted = alpha0 * t * logpt + (1.0 - alpha0) * (1.0 - t) * logpt
    fl_bc = -jnp.mean(jnp.power(1.0 - pt, gamma) * weighted, axis=(2, 3, 4))  # (B, C)
    per_channel = jnp.mean(fl_bc, axis=0)
    if skip_first:
        return loss_gain * jnp.sum(per_channel[1:])
    return loss_gain * jnp.sum(per_channel)


if __name__ == "__main__":
    key = jax.random.PRNGKey(0)
    k1, k2 = jax.random.split(key)

    B, C, D, H, W = 2, 4, 16, 16, 16
    logits = jax.random.normal(k1, (B, C, D, H, W), dtype=jnp.float32)
    labels = jax.random.randint(k2, (B, D, H, W), 0, C)
    # one-hot target laid out channel-first, same shape as the input (module layout)
    target = jnp.transpose(
        jax.nn.one_hot(labels, C, dtype=jnp.float32), (0, 4, 1, 2, 3)
    )

    def check(x, t, **kw):
        got = jax.block_until_ready(focal_loss1(x, t, **kw))
        want = _reference_loss(
            x, t, gamma=2.0, alpha=0.75, epsilon=1e-5, loss_gain=1.0, skip_first=True
        )
        assert jnp.allclose(got, want, rtol=1e-4, atol=1e-5), (got, want)

    # default VMEM-budgeted tile pick (int8 label path, single step per batch)
    check(logits, target)
    # forced smaller tile: multi-step resident accumulation + int32 label fallback
    check(logits, target, block_rows=16)
    # B == 1: exercises the 2-way spatial-outer split (v7x dual-TensorCore path)
    check(logits[:1], target[:1], block_rows=8)

    print("KERNEL_OK")
</pallas_src>

<mosaic_0001>
module attributes {stable_mosaic.version = 11 : i64} {
  func.func @_focal_kernel(%arg0: i32, %arg1: i32, %arg2: i32, %arg3: memref<1x4x32x128xf32, #tpu.memory_space<vmem>>, %arg4: memref<1x32x128xi8, #tpu.memory_space<vmem>>, %arg5: memref<1x1x32x128xf32, #tpu.memory_space<vmem>>) attributes {dimension_semantics = [#tpu.dimension_semantics<parallel>, #tpu.dimension_semantics<parallel>, #tpu.dimension_semantics<arbitrary>], iteration_bounds = array<i64: 2, 1, 1>, scalar_prefetch = 0 : i64, scratch_operands = 0 : i64, tpu.core_type = #tpu.core_type<tc>, window_params = [{transform_indices = @transform_0, window_bounds = array<i64: 1, 4, 32, 128>}, {transform_indices = @transform_1, window_bounds = array<i64: 1, 32, 128>}, {transform_indices = @transform_2, window_bounds = array<i64: 1, 1, 32, 128>}]} {
    %c0_i32 = arith.constant 0 : i32
    %0 = arith.cmpi eq, %arg2, %c0_i32 : i32
    %1 = arith.extui %0 : i1 to i32
    %c0_i32_0 = arith.constant 0 : i32
    %2 = arith.cmpi ne, %1, %c0_i32_0 : i32
    scf.if %2 {
      %cst_35 = arith.constant 0.000000e+00 : f32
      %88 = vector.broadcast %cst_35 : f32 to vector<1x1x32x128xf32>
      %c0_36 = arith.constant 0 : index
      %c0_37 = arith.constant 0 : index
      %c0_38 = arith.constant 0 : index
      %c0_39 = arith.constant 0 : index
      %89 = vector.load %arg5[%c0_36, %c0_37, %c0_38, %c0_39] : memref<1x1x32x128xf32, #tpu.memory_space<vmem>>, vector<1x1x32x128xf32>
      tpu.vector_store %arg5[%c0_36, %c0_37, %c0_38, %c0_39], %88 {strides = array<i32>} : memref<1x1x32x128xf32, #tpu.memory_space<vmem>>, vector<1x1x32x128xf32>,
    } else {
    }
    %c0 = arith.constant 0 : index
    %c0_1 = arith.constant 0 : index
    %c0_2 = arith.constant 0 : index
    %c0_3 = arith.constant 0 : index
    %3 = vector.load %arg3[%c0, %c0_1, %c0_2, %c0_3] : memref<1x4x32x128xf32, #tpu.memory_space<vmem>>, vector<1x4x32x128xf32>
    %4 = vector.shape_cast %3 : vector<1x4x32x128xf32> to vector<4x32x128xf32>
    %c0_4 = arith.constant 0 : index
    %c0_5 = arith.constant 0 : index
    %c0_6 = arith.constant 0 : index
    %5 = vector.load %arg4[%c0_4, %c0_5, %c0_6] : memref<1x32x128xi8, #tpu.memory_space<vmem>>, vector<1x32x128xi8>
    %6 = vector.shape_cast %5 : vector<1x32x128xi8> to vector<32x128xi8>
    %7 = arith.extsi %6 : vector<32x128xi8> to vector<32x128xi32>
    %cst = arith.constant dense<0xFF800000> : vector<32x128xf32>
    %8 = vector.multi_reduction <maximumf>, %4, %cst [0] : vector<4x32x128xf32> to vector<32x128xf32>
    %9 = vector.shape_cast %8 : vector<32x128xf32> to vector<1x32x128xf32>
    %10 = vector.broadcast %9 : vector<1x32x128xf32> to vector<4x32x128xf32>
    %11 = arith.subf %4, %10 : vector<4x32x128xf32>
    %12 = math.exp %11 : vector<4x32x128xf32>
    %cst_7 = arith.constant dense<0.000000e+00> : vector<32x128xf32>
    %13 = vector.multi_reduction <add>, %12, %cst_7 [0] : vector<4x32x128xf32> to vector<32x128xf32>
    %14 = tpu.reciprocal %13 : vector<32x128xf32> -> vector<32x128xf32>
    %15 = vector.extract_strided_slice %12 {offsets = [1, 0, 0], sizes = [1, 32, 128], strides = [1, 1, 1]} : vector<4x32x128xf32> to vector<1x32x128xf32>
    %16 = vector.shape_cast %15 : vector<1x32x128xf32> to vector<32x128xf32>
    %17 = arith.mulf %16, %14 : vector<32x128xf32>
    %c1_i32 = arith.constant 1 : i32
    %18 = vector.broadcast %c1_i32 : i32 to vector<32x128xi32>
    %19 = arith.cmpi eq, %7, %18 : vector<32x128xi32>
    %cst_8 = arith.constant 9.99999974E-6 : f32
    %20 = vector.broadcast %cst_8 : f32 to vector<32x128xf32>
    %21 = arith.addf %17, %20 : vector<32x128xf32>
    %cst_9 = arith.constant 1.000000e+00 : f32
    %22 = vector.broadcast %cst_9 : f32 to vector<32x128xf32>
    %23 = arith.subf %22, %17 : vector<32x128xf32>
    %cst_10 = arith.constant 9.99999974E-6 : f32
    %24 = vector.broadcast %cst_10 : f32 to vector<32x128xf32>
    %25 = arith.addf %23, %24 : vector<32x128xf32>
    %26 = arith.select %19, %21, %25 : vector<32x128xi1>, vector<32x128xf32>
    %27 = math.log %26 : vector<32x128xf32>
    %cst_11 = arith.constant 7.500000e-01 : f32
    %cst_12 = arith.constant 2.500000e-01 : f32
    %28 = vector.broadcast %cst_11 : f32 to vector<32x128xf32>
    %29 = vector.broadcast %cst_12 : f32 to vector<32x128xf32>
    %30 = arith.select %19, %28, %29 : vector<32x128xi1>, vector<32x128xf32>
    %cst_13 = arith.constant 1.000000e+00 : f32
    %31 = vector.broadcast %cst_13 : f32 to vector<32x128xf32>
    %32 = arith.subf %31, %26 : vector<32x128xf32>
    %33 = arith.mulf %32, %32 : vector<32x128xf32>
    %34 = arith.mulf %30, %27 : vector<32x128xf32>
    %35 = arith.mulf %33, %34 : vector<32x128xf32>
    %36 = vector.extract_strided_slice %12 {offsets = [2, 0, 0], sizes = [1, 32, 128], strides = [1, 1, 1]} : vector<4x32x128xf32> to vector<1x32x128xf32>
    %37 = vector.shape_cast %36 : vector<1x32x128xf32> to vector<32x128xf32>
    %38 = arith.mulf %37, %14 : vector<32x128xf32>
    %c2_i32 = arith.constant 2 : i32
    %39 = vector.broadcast %c2_i32 : i32 to vector<32x128xi32>
    %40 = arith.cmpi eq, %7, %39 : vector<32x128xi32>
    %cst_14 = arith.constant 9.99999974E-6 : f32
    %41 = vector.broadcast %cst_14 : f32 to vector<32x128xf32>
    %42 = arith.addf %38, %41 : vector<32x128xf32>
    %cst_15 = arith.constant 1.000000e+00 : f32
    %43 = vector.broadcast %cst_15 : f32 to vector<32x128xf32>
    %44 = arith.subf %43, %38 : vector<32x128xf32>
    %cst_16 = arith.constant 9.99999974E-6 : f32
    %45 = vector.broadcast %cst_16 : f32 to vector<32x128xf32>
    %46 = arith.addf %44, %45 : vector<32x128xf32>
    %47 = arith.select %40, %42, %46 : vector<32x128xi1>, vector<32x128xf32>
    %48 = math.log %47 : vector<32x128xf32>
    %cst_17 = arith.constant 7.500000e-01 : f32
    %cst_18 = arith.constant 2.500000e-01 : f32
    %49 = vector.broadcast %cst_17 : f32 to vector<32x128xf32>
    %50 = vector.broadcast %cst_18 : f32 to vector<32x128xf32>
    %51 = arith.select %40, %49, %50 : vector<32x128xi1>, vector<32x128xf32>
    %cst_19 = arith.constant 1.000000e+00 : f32
    %52 = vector.broadcast %cst_19 : f32 to vector<32x128xf32>
    %53 = arith.subf %52, %47 : vector<32x128xf32>
    %54 = arith.mulf %53, %53 : vector<32x128xf32>
    %55 = arith.mulf %51, %48 : vector<32x128xf32>
    %56 = arith.mulf %54, %55 : vector<32x128xf32>
    %57 = arith.addf %35, %56 : vector<32x128xf32>
    %58 = vector.extract_strided_slice %12 {offsets = [3, 0, 0], sizes = [1, 32, 128], strides = [1, 1, 1]} : vector<4x32x128xf32> to vector<1x32x128xf32>
    %59 = vector.shape_cast %58 : vector<1x32x128xf32> to vector<32x128xf32>
    %60 = arith.mulf %59, %14 : vector<32x128xf32>
    %c3_i32 = arith.constant 3 : i32
    %61 = vector.broadcast %c3_i32 : i32 to vector<32x128xi32>
    %62 = arith.cmpi eq, %7, %61 : vector<32x128xi32>
    %cst_20 = arith.constant 9.99999974E-6 : f32
    %63 = vector.broadcast %cst_20 : f32 to vector<32x128xf32>
    %64 = arith.addf %60, %63 : vector<32x128xf32>
    %cst_21 = arith.constant 1.000000e+00 : f32
    %65 = vector.broadcast %cst_21 : f32 to vector<32x128xf32>
    %66 = arith.subf %65, %60 : vector<32x128xf32>
    %cst_22 = arith.constant 9.99999974E-6 : f32
    %67 = vector.broadcast %cst_22 : f32 to vector<32x128xf32>
    %68 = arith.addf %66, %67 : vector<32x128xf32>
    %69 = arith.select %62, %64, %68 : vector<32x128xi1>, vector<32x128xf32>
    %70 = math.log %69 : vector<32x128xf32>
    %cst_23 = arith.constant 7.500000e-01 : f32
    %cst_24 = arith.constant 2.500000e-01 : f32
    %71 = vector.broadcast %cst_23 : f32 to vector<32x128xf32>
    %72 = vector.broadcast %cst_24 : f32 to vector<32x128xf32>
    %73 = arith.select %62, %71, %72 : vector<32x128xi1>, vector<32x128xf32>
    %cst_25 = arith.constant 1.000000e+00 : f32
    %74 = vector.broadcast %cst_25 : f32 to vector<32x128xf32>
    %75 = arith.subf %74, %69 : vector<32x128xf32>
    %76 = arith.mulf %75, %75 : vector<32x128xf32>
    %77 = arith.mulf %73, %70 : vector<32x128xf32>
    %78 = arith.mulf %76, %77 : vector<32x128xf32>
    %79 = arith.addf %57, %78 : vector<32x128xf32>
    %c0_26 = arith.constant 0 : index
    %c0_27 = arith.constant 0 : index
    %c0_28 = arith.constant 0 : index
    %c0_29 = arith.constant 0 : index
    %80 = vector.load %arg5[%c0_26, %c0_27, %c0_28, %c0_29] : memref<1x1x32x128xf32, #tpu.memory_space<vmem>>, vector<1x1x32x128xf32>
    %81 = vector.shape_cast %80 : vector<1x1x32x128xf32> to vector<32x128xf32>
    %cst_30 = arith.constant 0.000000e+00 : f32
    %82 = vector.broadcast %cst_30 : f32 to vector<32x128xf32>
    %83 = arith.subf %82, %79 : vector<32x128xf32>
    %84 = arith.addf %81, %83 : vector<32x128xf32>
    %c0_31 = arith.constant 0 : index
    %c0_32 = arith.constant 0 : index
    %c0_33 = arith.constant 0 : index
    %c0_34 = arith.constant 0 : index
    %85 = vector.load %arg5[%c0_31, %c0_32, %c0_33, %c0_34] : memref<1x1x32x128xf32, #tpu.memory_space<vmem>>, vector<1x1x32x128xf32>
    %86 = vector.shape_cast %85 : vector<1x1x32x128xf32> to vector<32x128xf32>
    %87 = vector.shape_cast %84 : vector<32x128xf32> to vector<1x1x32x128xf32>
    tpu.vector_store %arg5[%c0_31, %c0_32, %c0_33, %c0_34], %87 {strides = array<i32>} : memref<1x1x32x128xf32, #tpu.memory_space<vmem>>, vector<1x1x32x128xf32>,
    return
  }
  func.func @transform_0(%arg0: i32, %arg1: i32, %arg2: i32) -> (i32, i32, i32, i32) {
    %c1_i32 = arith.constant 1 : i32
    %0 = arith.muli %arg1, %c1_i32 : i32
    %1 = arith.addi %0, %arg2 : i32
    %c0_i32 = arith.constant 0 : i32
    %c0_i32_0 = arith.constant 0 : i32
    %c0_i32_1 = arith.constant 0 : i32
    return %arg0, %c0_i32, %1, %c0_i32_0 : i32, i32, i32, i32
  }
  func.func @transform_1(%arg0: i32, %arg1: i32, %arg2: i32) -> (i32, i32, i32) {
    %c1_i32 = arith.constant 1 : i32
    %0 = arith.muli %arg1, %c1_i32 : i32
    %1 = arith.addi %0, %arg2 : i32
    %c0_i32 = arith.constant 0 : i32
    %c0_i32_0 = arith.constant 0 : i32
    return %arg0, %1, %c0_i32 : i32, i32, i32
  }
  func.func @transform_2(%arg0: i32, %arg1: i32, %arg2: i32) -> (i32, i32, i32, i32) {
    %c0_i32 = arith.constant 0 : i32
    %c0_i32_0 = arith.constant 0 : i32
    %c0_i32_1 = arith.constant 0 : i32
    return %arg0, %arg1, %c0_i32, %c0_i32_0 : i32, i32, i32, i32
  }
}

</mosaic_0001>

<bundles_post_ra>
// kernel: tpu_custom_call.1
= control target key start
LH: loop header
LB: loop body
LE: loop exit
PB: predicated region body
PF: predicated region fallthrough
CT: control target
= control target key end

     0   :  { %7 = vsyncpa [#allocation3], 0  ;;  %s1320_s0 = inlined_call_operand.hbm [shape: f32[2,4,32,128], index: 0, kind: input, shape index: {}]   ;;  %s1321_s1 = inlined_call_operand.hbm [shape: s8[2,32,128], index: 1, kind: input, shape index: {}]   ;;  %s1322_s2 = inlined_call_operand.hbm [shape: f32[2,1,32,128], index: 2, kind: output, shape index: {}]  }
   0x1   :  { %9 = vsyncpa [#allocation3 + $0x1], 0 }
   0x2   :  { %10 = vsyncpa [#allocation6], 0 }
   0x3   :  { %12 = vsyncpa [#allocation6 + $0x1], 0 }
   0x4   :  { %13 = vsyncpa [#allocation4], 0 }
   0x5   :  { %15 = vsyncpa [#allocation4 + $0x1], 0  ;;  %s975_s9 = smov 0   ;;  %s977_s10 = smov 0  }
   0x6   :  { %s979_s11 = smov 0   ;;  %s981_s12 = smov 0  }
   0x7   :  { %s983_s13 = smov 0   ;;  %s985_s14 = smov 0  }
   0x8 LB: > { %s653_s15 = sadd.s32 4294967295, %s950_s14   ;;  %s654_s16 = sadd.s32 4294967294, %s950_s14   ;;  %s950_s14 = sphi %s985_s14, %s21_s14   ;;  %s946_s13 = sphi %s983_s13, %s1333_s13   ;;  %s942_s12 = sphi %s981_s12, %s1332_s12   ;;  %s938_s11 = sphi %s979_s11, %s1331_s11   ;;  %s934_s10 = sphi %s977_s10, %s1330_s10   ;;  %s930_s9 = sphi %s975_s9, %s1329_s9  }
   0x9   : > { %s40_s17 = sadd.s32 1, %s946_s13  ;;  %s51_s18 = sadd.s32 1, %s938_s11 }
   0xa   : > { %p42_p0 = scmp.ge.s32.totalorder %s40_s17, 2  ;;  %p58_p1 = scmp.ne.s32.totalorder %s938_s11, %s934_s10 }
   0xb   : > { %p59_p2 = scmp.eq.s32.totalorder %s950_s14, 0  ;;  %p64_p3 = scmp.ne.s32.totalorder %s934_s10, %s930_s9 }
   0xc   : > { %s1335_s17 = smov (%p42_p0, %s40_s17), 0  ;;  %p65_p5 = scmp.eq.s32.totalorder %s653_s15, 0 }
   0xd   : > { %p1016_p4 = por %p59_p2, %p58_p1  ;;  %s46_s20 = ssub.s32 %s946_s13, %s1335_s17 }
   0xe   : > { %p120_p6 = scmp.eq.s32.totalorder %s653_s15, 1  ;;  %p49_p7 = scmp.eq.s32.totalorder %s46_s20, 0 }
   0xf   : > { %p1022_p8 = por %p65_p5, %p64_p3  ;;  %p126_p10 = scmp.eq.s32.totalorder %s654_s16, 1 }
  0x10   : > { %p1026_p9 = por %p120_p6, %p58_p1  ;;  %p656_p12 = scmp.ge.s32.totalorder %s950_s14, 2 }
  0x11   : > { %s1031_s23 = scalar_select %p49_p7, %s938_s11, %s51_s18  }
  0x12   : > { %p1033_p11 = por %p126_p10, %p64_p3  ;;  %p690_p13 = scmp.lt.s32.totalorder %s950_s14, 2 }
  0x13   : > { %s1040_s25 = sand.u32 1, %s938_s11   ;;  %s671_s27 = sshll.u32 %s946_s13, 11 }
  0x14   : > { %s657_s26 = sshll.u32 %s1040_s25, 7  ;;  %s159_s30 = scalar_lea.hbm %s1320_s0, %s671_s27 }
  0x15   : > { %s150_s3 = scalar_lea.vmem [#allocation2], %s657_s26  ;;  %p1049_p0 = pnand %p690_p13, %p1016_p4 }
  0x16   : > { %s160_s4 = sshll.u32 %s150_s3, 4  ;;  %p662_p1 = scmp.ge.s32.totalorder %s950_s14, 1  ;;  %s161_s4 = int_to_ptr.vmem [resolvable:$true] %s160_s4 }
  0x17   : > { %s147_s6 = scalar_lea.sflag [#allocation3], %s1040_s25  ;;  %p812_p2 = pneg %p1049_p0 }
  0x18   : > { %s823_s7 = scalar_lea.vmem %s161_s4, 2048  ;;  %s952_s8 = smov [#allocation2]  }
  0x19   : > { %p824_p3 = scmp.ne.s32.totalorder %s161_s4, %s823_s7  ;;  %s828_s15 = sshll.u32 %s952_s8, 4  ;;  %s829_s15 = int_to_ptr.vmem [resolvable:$false] %s828_s15 }
  0x1a   : > { %s830_s16 = scalar_lea.vmem %s829_s15, 4096  ;;  %p831_p4 = scmp.lt.s32.totalorder %s161_s4, %s829_s15 }
  0x1b   : > { %p826_p5 = pnand %p824_p3, %p812_p2  ;;  %p832_p7 = scmp.lt.s32.totalorder %s830_s16, %s823_s7 }
  0x1d   : > { %p827_p6 = pneg %p826_p5  ;;  %p833_p10 = por %p832_p7, %p831_p4 }
  0x1f   : > { %p834_p13 = pnand %p833_p10, %p827_p6 }
  0x21   : > { %837 = shalt.err (!%p834_p13)
}
  0x22   : > { %s953_s18 = smov 128   ;;  %s954_s19 = smov 8  }
  0x23   : > { %682 = dma.hbm_to_vmem [thread:$0]  (!%p1049_p0), %s159_s30, 2048, %s161_s4, %s147_s6, %s953_s18, %s953_s18, %s954_s19  }
  0x24   : > { %p188_p3 = scmp.lt.s32.totalorder %s950_s14, 3  ;;  %s660_s20 = sshll.u32 %s1040_s25, 3 }
  0x25   : > { %s661_s26 = sshll.u32 %s946_s13, 7  ;;  %s174_s7 = scalar_lea.vmem [#allocation5], %s660_s20 }
  0x26   : > { %p1067_p5 = pnand %p662_p1, %p188_p3  ;;  %s181_s3 = scalar_lea.hbm %s1321_s1, %s661_s26 }
  0x27   : > { %s183_s8 = sshll.u32 %s174_s7, 4  ;;  %s171_s15 = scalar_lea.sflag [#allocation6], %s1040_s25  ;;  %s184_s8 = int_to_ptr.vmem [resolvable:$true] %s183_s8 }
  0x28   : > { %s851_s16 = scalar_lea.vmem %s184_s8, 128  ;;  %s955_s30 = smov [#allocation5]  }
  0x29   : > { %p852_p6 = scmp.ne.s32.totalorder %s184_s8, %s851_s16  ;;  %s856_s4 = sshll.u32 %s955_s30, 4  ;;  %s857_s4 = int_to_ptr.vmem [resolvable:$false] %s856_s4 }
  0x2a   : > { %s858_s6 = scalar_lea.vmem %s857_s4, 256  ;;  %p859_p1 = scmp.lt.s32.totalorder %s184_s8, %s857_s4 }
  0x2b   : > { %p854_p4 = pnand %p852_p6, %p812_p2  ;;  %p860_p10 = scmp.lt.s32.totalorder %s858_s6, %s851_s16 }
  0x2d   : > { %p855_p7 = pneg %p854_p4  ;;  %p861_p13 = por %p860_p10, %p859_p1 }
  0x2f   : > { %p862_p3 = pnand %p861_p13, %p855_p7 }
  0x31   : > { %865 = shalt.err (!%p862_p3)
}
  0x32   : > { %685 = dma.hbm_to_vmem [thread:$0]  (!%p1049_p0), %s181_s3, 128, %s184_s8, %s171_s15  }
  0x33   : > { %192 = sbr.rel (%p1067_p5) target bundleno = 173 (0xad), region = 28  ;;  %s1083_s25 = sand.u32 (!%p1067_p5), 1, %s934_s10  }
  0x34   : > { %s663_s18 = sshll.u32 (!%p1067_p5), %s1083_s25, 7  ;;  %s195_s19 = scalar_lea.sflag (!%p1067_p5), [#allocation3], %s1083_s25 }
  0x35   : > { %s1087_s20 = scalar_lea.vmem (!%p1067_p5), [#allocation2], %s663_s18 }
  0x38   : > { %917 = dma.done.wait (%p1022_p8), %s195_s19, 2048  }
  0x39   : > { %919 = vsyncadd (%p1022_p8), %s195_s19, 4294965248  ;;  %s664_s5 = sshll.u32 %s1083_s25, 3  ;;  %s204_s26 = scalar_lea.sflag [#allocation6], %s1083_s25 }
  0x3a   : > { %s1095_s27 = scalar_lea.vmem [#allocation5], %s664_s5 }
  0x3b   : > { %921 = dma.done.wait (%p1022_p8), %s204_s26, 128  }
  0x3c   : > { %923 = vsyncadd (%p1022_p8), %s204_s26, 4294967168  ;;  %v244_v0 = vld [vmem:[%s1087_s20] sm:$0xff]  ;;  %v245_v4 = vld [vmem:[%s1087_s20 + $0x8] sm:$0xff]  ;;  %s665_s21 = sshll.u32 %s1083_s25, 5  ;;  %s672_s29 = sshll.u32 %s942_s12, 9 }
  0x3d   : > { %v248_v1 = vld [vmem:[%s1087_s20 + $0x20] sm:$0xff]  ;;  %v249_v6 = vld [vmem:[%s1087_s20 + $0x28] sm:$0xff]  ;;  %v246_v12 = vld [vmem:[%s1087_s20 + $0x10] sm:$0xff]  ;;  %s1249_s28 = scalar_lea.vmem [#allocation7], %s665_s21  ;;  %s1269_s15 = scalar_lea.hbm %s1322_s2, %s672_s29 }
  0x3e   : > { %v252_v2 = vld [vmem:[%s1087_s20 + $0x40] sm:$0xff]  ;;  %v265_v3 = vmax.f32 %v244_v0, %v248_v1  ;;  %v253_v8 = vld [vmem:[%s1087_s20 + $0x48] sm:$0xff]  ;;  %v268_v9 = vmax.f32 %v245_v4, %v249_v6  ;;  %v250_v13 = vld [vmem:[%s1087_s20 + $0x30] sm:$0xff]  ;;  %s537_s3 = sshll.u32 %s1249_s28, 4  ;;  %s522_s16 = scalar_lea.sflag [#allocation4], %s1083_s25  ;;  %s1271_s3 = int_to_ptr.vmem [resolvable:$true] %s537_s3 }
  0x3f   : > { %v256_v5 = vld [vmem:[%s1087_s20 + $0x60] sm:$0xff]  ;;  %v257_v11 = vld [vmem:[%s1087_s20 + $0x68] sm:$0xff]  ;;  %v247_v15 = vld [vmem:[%s1087_s20 + $0x18] sm:$0xff]  ;;  %v271_v23 = vmax.f32 %v246_v12, %v250_v13  ;;  %s866_s30 = scalar_lea.vmem %s1271_s3, 512  ;;  %s957_s12 = smov [#allocation7]  }
  0x40   : > { %v266_v7 = vmax.f32 %v265_v3, %v252_v2  ;;  %v269_v14 = vmax.f32 %v268_v9, %v253_v8  ;;  %v251_v16 = vld [vmem:[%s1087_s20 + $0x38] sm:$0xff]  ;;  %v254_v22 = vld [vmem:[%s1087_s20 + $0x50] sm:$0xff]  ;;  %p867_p8 = scmp.ne.s32.totalorder %s1271_s3, %s866_s30  ;;  %s870_s4 = sshll.u32 %s957_s12, 4  ;;  %s871_s4 = int_to_ptr.vmem [resolvable:$false] %s870_s4 }
  0x41   : > { %v274_v27 = vmax.f32 %v247_v15, %v251_v16  ;;  %v258_v32 = vld [vmem:[%s1087_s20 + $0x70] sm:$0xff]  ;;  %v272_v34 = vmax.f32 %v271_v23, %v254_v22  ;;  %v255_v35 = vld [vmem:[%s1087_s20 + $0x58] sm:$0xff]  ;;  %s872_s6 = scalar_lea.vmem %s871_s4, 1024  ;;  %p873_p5 = scmp.lt.s32.totalorder %s1271_s3, %s871_s4 }
  0x42   : > { %v267_v10 = vmax.f32 %v266_v7, %v256_v5  ;;  %v270_v21 = vmax.f32 %v269_v14, %v257_v11  ;;  %v259_v45 = vld [vmem:[%s1087_s20 + $0x78] sm:$0xff]  ;;  %p868_p0 = pnand %p867_p8, %p1026_p9  ;;  %p874_p6 = scmp.lt.s32.totalorder %s872_s6, %s866_s30 }
  0x43   : > { %v273_v39 = vmax.f32 %v272_v34, %v258_v32  ;;  %v275_v41 = vmax.f32 %v274_v27, %v255_v35 }
  0x44   : > { %v277_v17 = vsub.f32 %v244_v0, %v267_v10  ;;  %v281_v18 = vsub.f32 %v248_v1, %v267_v10  ;;  %v285_v19 = vsub.f32 %v252_v2, %v267_v10  ;;  %v289_v20 = vsub.f32 %v256_v5, %v267_v10  ;;  %p869_p2 = pneg %p868_p0  ;;  %p875_p4 = por %p874_p6, %p873_p5 }
  0x45   : > { %v278_v29 = vsub.f32 %v245_v4, %v270_v21  ;;  %v282_v30 = vsub.f32 %v249_v6, %v270_v21  ;;  %v286_v31 = vsub.f32 %v253_v8, %v270_v21  ;;  %v290_v33 = vsub.f32 %v257_v11, %v270_v21 }
  0x46   : > { %v293_v24 = vmul.f32 1.442695, %v277_v17  ;;  %v301_v25 = vmul.f32 1.442695, %v281_v18  ;;  %v309_v26 = vmul.f32 1.442695, %v285_v19  ;;  %v279_v42 = vsub.f32 %v246_v12, %v273_v39  ;;  %p876_p7 = pnand %p875_p4, %p869_p2 }
  0x47   : > { %v317_v28 = vmul.f32 1.442695, %v289_v20  ;;  %v295_v36 = vmul.f32 1.442695, %v278_v29  ;;  %v303_v37 = vmul.f32 1.442695, %v282_v30  ;;  %v283_v43 = vsub.f32 %v250_v13, %v273_v39 }
  0x48   : > { %746 = vpow2.f32 %v293_v24  ;;  %v311_v38 = vmul.f32 1.442695, %v286_v31  ;;  %v319_v40 = vmul.f32 1.442695, %v290_v33  ;;  %v287_v44 = vsub.f32 %v254_v22, %v273_v39  ;;  %v260_v22 = vld [vmem:[%s1095_s27] sm:$0xff] }
  0x49   : > { %748 = vpow2.f32 %v301_v25  ;;  %v291_v46 = vsub.f32 %v258_v32, %v273_v39  ;;  %v297_v47 = vmul.f32 1.442695, %v279_v42  ;;  %v305_v48 = vmul.f32 1.442695, %v283_v43 }
  0x4a   : > { %750 = vpow2.f32 %v309_v26  ;;  %v313_v49 = vmul.f32 1.442695, %v287_v44  ;;  %v276_v51 = vmax.f32 %v275_v41, %v259_v45  ;;  %v261_v24 = vunpack.c.0.s8 %v260_v22 }
  0x4b   : > { %752 = vpow2.f32 %v317_v28  ;;  %v321_v50 = vmul.f32 1.442695, %v291_v46  ;;  %v1136_v27 = vunpack.c.1.s8 %v260_v22  ;;  %v1138_v31 = vunpack.c.2.s8 %v260_v22 }
  0x4c   : > { %754 = vpow2.f32 %v295_v36  ;;  %v280_v52 = vsub.f32 %v247_v15, %v276_v51  ;;  %v284_v53 = vsub.f32 %v251_v16, %v276_v51  ;;  %v288_v54 = vsub.f32 %v255_v35, %v276_v51 }
  0x4d   : > { %756 = vpow2.f32 %v303_v37  ;;  %v292_v55 = vsub.f32 %v259_v45, %v276_v51  ;;  %vm345_vm0 = vcmp.eq.s32.totalorder %v261_v24, 1  ;;  %v1140_v32 = vunpack.c.3.s8 %v260_v22 }
  0x4e   : > { %758 = vpow2.f32 %v311_v38  ;;  %v299_v56 = vmul.f32 1.442695, %v280_v52  ;;  %v307_v57 = vmul.f32 1.442695, %v284_v53  ;;  %v315_v58 = vmul.f32 1.442695, %v288_v54 }
  0x4f   : > { %760 = vpow2.f32 %v319_v40  ;;  %v323_v59 = vmul.f32 1.442695, %v292_v55  ;;  %vm397_vm1 = vcmp.eq.s32.totalorder %v261_v24, 2  ;;  %vm453_vm2 = vcmp.eq.s32.totalorder %v261_v24, 3 }
  0x50   : > { %762 = vpow2.f32 %v297_v47  ;;  %vm346_vm3 = vcmp.eq.s32.totalorder %v1136_v27, 1  ;;  %v956_v43 = vmov 0.25   ;;  %vm398_vm4 = vcmp.eq.s32.totalorder %v1136_v27, 2 }
  0x51   : > { %764 = vpow2.f32 %v305_v48  ;;  %v1145_v44 = vsel %vm345_vm0, 0.75, %v956_v43  ;;  %v1151_v52 = vsel %vm397_vm1, 0.75, %v956_v43  ;;  %v1156_v54 = vsel %vm453_vm2, 0.75, %v956_v43 }
  0x52   : > { %766 = vpow2.f32 %v313_v49  ;;  %vm454_vm5 = vcmp.eq.s32.totalorder %v1136_v27, 3  ;;  %vm347_vm6 = vcmp.eq.s32.totalorder %v1138_v31, 1  ;;  %vm399_vm7 = vcmp.eq.s32.totalorder %v1138_v31, 2 }
  0x53   : > { %768 = vpow2.f32 %v321_v50  ;;  %vm455_vm8 = vcmp.eq.s32.totalorder %v1138_v31, 3  ;;  %vm348_vm9 = vcmp.eq.s32.totalorder %v1140_v32, 1  ;;  %vm400_vm10 = vcmp.eq.s32.totalorder %v1140_v32, 2 }
  0x54   : > { %770 = vpow2.f32 %v299_v56  ;;  %vm456_vm11 = vcmp.eq.s32.totalorder %v1140_v32, 3 }
  0x55   : > { %v747_v60 = vpop.eup %746  ;;  %772 = vpow2.f32 %v307_v57  ;;  %v1161_v57 = vsel %vm346_vm3, 0.75, %v956_v43 }
  0x56   : > { %v749_v61 = vpop.eup %748  ;;  %774 = vpow2.f32 %v315_v58 }
  0x57   : > { %v751_v62 = vpop.eup %750  ;;  %v325_v63 = vadd.f32 %v749_v61, %v747_v60  ;;  %776 = vpow2.f32 %v323_v59 }
  0x58   : > { %v753_v0 = vpop.eup %752 }
  0x59   : > { %v755_v1 = vpop.eup %754  ;;  %v326_v2 = vadd.f32 %v751_v62, %v325_v63 }
  0x5a   : > { %v757_v3 = vpop.eup %756 }
  0x5b   : > { %v759_v4 = vpop.eup %758  ;;  %v327_v5 = vadd.f32 %v753_v0, %v326_v2  ;;  %v328_v6 = vadd.f32 %v757_v3, %v755_v1 }
  0x5c   : > { %v761_v7 = vpop.eup %760 }
  0x5d   : > { %v763_v8 = vpop.eup %762  ;;  %778 = vrcp.f32 %v327_v5  ;;  %v329_v9 = vadd.f32 %v759_v4, %v328_v6 }
  0x5e   : > { %v1117_v10 = vpop.eup %764 }
  0x5f   : > { %v1119_v11 = vpop.eup %766  ;;  %v330_v12 = vadd.f32 %v761_v7, %v329_v9  ;;  %v331_v13 = vadd.f32 %v1117_v10, %v763_v8 }
  0x60   : > { %v1122_v14 = vpop.eup %768 }
  0x61   : > { %780 = vrcp.f32 %v330_v12  ;;  %v332_v15 = vadd.f32 %v1119_v11, %v331_v13  ;;  %v771_v16 = vpop.eup %770 }
  0x62   : > { %v1125_v17 = vpop.eup %772 }
  0x63   : > { %v333_v18 = vadd.f32 %v1122_v14, %v332_v15  ;;  %v1128_v19 = vpop.eup %774  ;;  %v334_v20 = vadd.f32 %v1125_v17, %v771_v16 }
  0x64   : > { %v1131_v21 = vpop.eup %776 }
  0x65   : > { %782 = vrcp.f32 %v333_v18  ;;  %v335_v23 = vadd.f32 %v1128_v19, %v334_v20 }
  0x67   : > { %v336_v25 = vadd.f32 %v1131_v21, %v335_v23 }
  0x69   : > { %784 = vrcp.f32 %v336_v25 }
  0x6a   : > { %v779_v26 = vpop.eup %778 }
  0x6b   : > { %v341_v28 = vmul.f32 %v779_v26, %v749_v61  ;;  %v393_v29 = vmul.f32 %v779_v26, %v751_v62  ;;  %v449_v30 = vmul.f32 %v779_v26, %v753_v0  ;;  %v1172_v61 = vsel %vm398_vm4, 0.75, %v956_v43 }
  0x6d   : > { %v349_v33 = vadd.f32 1e-05, %v341_v28  ;;  %v353_v34 = vsub.f32 1.0, %v341_v28  ;;  %v401_v35 = vadd.f32 1e-05, %v393_v29  ;;  %v405_v36 = vsub.f32 1.0, %v393_v29 }
  0x6e   : > { %v781_v37 = vpop.eup %780  ;;  %v457_v38 = vadd.f32 1e-05, %v449_v30  ;;  %v461_v39 = vsub.f32 1.0, %v449_v30 }
  0x6f   : > { %v357_v40 = vadd.f32 1e-05, %v353_v34  ;;  %v409_v41 = vadd.f32 1e-05, %v405_v36  ;;  %v342_v42 = vmul.f32 %v781_v37, %v757_v3  ;;  %v394_v46 = vmul.f32 %v781_v37, %v759_v4 }
  0x70   : > { %v465_v45 = vadd.f32 1e-05, %v461_v39  ;;  %v450_v47 = vmul.f32 %v781_v37, %v761_v7 }
  0x71   : > { %v361_v48 = vsel %vm345_vm0, %v349_v33, %v357_v40  ;;  %v413_v49 = vsel %vm397_vm1, %v401_v35, %v409_v41  ;;  %v350_v50 = vadd.f32 1e-05, %v342_v42  ;;  %v354_v51 = vsub.f32 1.0, %v342_v42 }
  0x72   : > { %786 = vlog2.f32 %v361_v48  ;;  %v469_v53 = vsel %vm453_vm2, %v457_v38, %v465_v45  ;;  %v783_v55 = vpop.eup %782  ;;  %v402_v58 = vadd.f32 1e-05, %v394_v46  ;;  %v406_v59 = vsub.f32 1.0, %v394_v46 }
  0x73   : > { %788 = vlog2.f32 %v413_v49  ;;  %v358_v56 = vadd.f32 1e-05, %v354_v51  ;;  %v458_v62 = vadd.f32 1e-05, %v450_v47  ;;  %v462_v63 = vsub.f32 1.0, %v450_v47 }
  0x74   : > { %790 = vlog2.f32 %v469_v53  ;;  %v410_v0 = vadd.f32 1e-05, %v406_v59  ;;  %v343_v1 = vmul.f32 %v783_v55, %v1117_v10  ;;  %v395_v3 = vmul.f32 %v783_v55, %v1119_v11 }
  0x75   : > { %v1167_v60 = vsel %vm346_vm3, %v350_v50, %v358_v56  ;;  %v466_v2 = vadd.f32 1e-05, %v462_v63  ;;  %v451_v4 = vmul.f32 %v783_v55, %v1122_v14  ;;  %v377_v9 = vsub.f32 1.0, %v361_v48 }
  0x76   : > { %792 = vlog2.f32 %v1167_v60  ;;  %v785_v5 = vpop.eup %784  ;;  %v1182_v6 = vsel %vm398_vm4, %v402_v58, %v410_v0  ;;  %v351_v7 = vadd.f32 1e-05, %v343_v1  ;;  %v355_v8 = vsub.f32 1.0, %v343_v1 }
  0x77   : > { %794 = vlog2.f32 %v1182_v6  ;;  %v1188_v10 = vsel %vm454_vm5, %v458_v62, %v466_v2  ;;  %v403_v12 = vadd.f32 1e-05, %v395_v3  ;;  %v407_v13 = vsub.f32 1.0, %v395_v3 }
  0x78   : > { %796 = vlog2.f32 %v1188_v10  ;;  %v359_v11 = vadd.f32 1e-05, %v355_v8  ;;  %v429_v14 = vsub.f32 1.0, %v413_v49  ;;  %v459_v15 = vadd.f32 1e-05, %v451_v4 }
  0x79   : > { %v463_v16 = vsub.f32 1.0, %v451_v4  ;;  %v344_v18 = vmul.f32 %v785_v5, %v1125_v17  ;;  %v485_v20 = vsub.f32 1.0, %v469_v53  ;;  %v411_v23 = vadd.f32 1e-05, %v407_v13 }
  0x7a   : > { %v1195_v22 = vsel %vm347_vm6, %v351_v7, %v359_v11  ;;  %v396_v24 = vmul.f32 %v785_v5, %v1128_v19  ;;  %v381_v25 = vmul.f32 %v377_v9, %v377_v9  ;;  %v433_v34 = vmul.f32 %v429_v14, %v429_v14 }
  0x7b   : > { %798 = vlog2.f32 %v1195_v22  ;;  %v467_v26 = vadd.f32 1e-05, %v463_v16  ;;  %v1202_v28 = vsel %vm399_vm7, %v403_v12, %v411_v23  ;;  %v352_v29 = vadd.f32 1e-05, %v344_v18 }
  0x7c   : > { %v356_v17 = vsub.f32 1.0, %v344_v18  ;;  %v408_v30 = vsub.f32 1.0, %v396_v24  ;;  %800 = vlog2.f32 %v1202_v28  ;;  %v404_v35 = vadd.f32 1e-05, %v396_v24 }
  0x7d   : > { %v1207_v19 = vsel %vm455_vm8, %v459_v15, %v467_v26  ;;  %v489_v38 = vmul.f32 %v485_v20, %v485_v20  ;;  %v378_v42 = vsub.f32 1.0, %v1167_v60  ;;  %v430_v45 = vsub.f32 1.0, %v1182_v6 }
  0x7e   : > { %802 = vlog2.f32 %v1207_v19  ;;  %v360_v39 = vadd.f32 1e-05, %v356_v17  ;;  %v412_v46 = vadd.f32 1e-05, %v408_v30  ;;  %v452_v50 = vmul.f32 %v785_v5, %v1131_v21 }
  0x7f   : > { %v787_v33 = vpop.eup %786  ;;  %v486_v55 = vsub.f32 1.0, %v1188_v10  ;;  %v382_v62 = vmul.f32 %v378_v42, %v378_v42  ;;  %v482_v21 = vsel %vm454_vm5, 0.75, %v956_v43  ;;  %v434_v6 = vmul.f32 %v430_v45, %v430_v45 }
  0x80   : > { %v789_v36 = vpop.eup %788  ;;  %v366_v37 = vmul.f32 0.6931472, %v787_v33  ;;  %v1215_v49 = vsel %vm348_vm9, %v352_v29, %v360_v39  ;;  %v1223_v56 = vsel %vm400_vm10, %v404_v35, %v412_v46  ;;  %v460_v2 = vadd.f32 1e-05, %v452_v50 }
  0x81   : > { %v791_v40 = vpop.eup %790  ;;  %v418_v41 = vmul.f32 0.6931472, %v789_v36  ;;  %804 = vlog2.f32 %v1215_v49  ;;  %v464_v3 = vsub.f32 1.0, %v452_v50  ;;  %v490_v8 = vmul.f32 %v486_v55, %v486_v55 }
  0x82   : > { %v385_v47 = vmul.f32 %v1145_v44, %v366_v37  ;;  %v474_v48 = vmul.f32 0.6931472, %v791_v40  ;;  %806 = vlog2.f32 %v1223_v56  ;;  %v431_v27 = vsub.f32 1.0, %v1202_v28 }
  0x83   : > { %v793_v51 = vpop.eup %792  ;;  %v437_v53 = vmul.f32 %v1151_v52, %v418_v41  ;;  %v379_v52 = vsub.f32 1.0, %v1195_v22  ;;  %v468_v9 = vadd.f32 1e-05, %v464_v3  ;;  %v487_v16 = vsub.f32 1.0, %v1207_v19 }
  0x84   : > { %v389_v58 = vmul.f32 %v385_v47, %v381_v25  ;;  %v493_v44 = vmul.f32 %v1156_v54, %v474_v48  ;;  %v368_v59 = vmul.f32 0.6931472, %v793_v51  ;;  %v795_v63 = vpop.eup %794  ;;  %v435_v26 = vmul.f32 %v431_v27, %v431_v27 }
  0x85   : > { %v441_v60 = vmul.f32 %v437_v53, %v433_v34  ;;  %v797_v4 = vpop.eup %796  ;;  %v420_v5 = vmul.f32 0.6931472, %v795_v63  ;;  %v383_v15 = vmul.f32 %v379_v52, %v379_v52  ;;  %v472_v18 = vsel %vm456_vm11, %v460_v2, %v468_v9 }
  0x86   : > { %v497_v0 = vmul.f32 %v493_v44, %v489_v38  ;;  %v386_v1 = vmul.f32 %v1161_v57, %v368_v59  ;;  %v476_v7 = vmul.f32 0.6931472, %v797_v4  ;;  %v375_v57 = vsel %vm347_vm6, 0.75, %v956_v43 }
  0x87   : > { %v445_v54 = vadd.f32 %v441_v60, %v389_v58  ;;  %v438_v12 = vmul.f32 %v1172_v61, %v420_v5  ;;  %808 = vlog2.f32 %v472_v18  ;;  %v427_v61 = vsel %vm399_vm7, 0.75, %v956_v43 }
  0x88   : > { %v390_v11 = vmul.f32 %v386_v1, %v382_v62  ;;  %v799_v13 = vpop.eup %798  ;;  %v494_v14 = vmul.f32 %v482_v21, %v476_v7  ;;  %v483_v28 = vsel %vm455_vm8, 0.75, %v956_v43  ;;  %v491_v19 = vmul.f32 %v487_v16, %v487_v16 }
  0x89   : > { %v501_v10 = vadd.f32 %v497_v0, %v445_v54  ;;  %v442_v22 = vmul.f32 %v438_v12, %v434_v6  ;;  %v370_v23 = vmul.f32 0.6931472, %v799_v13  ;;  %v801_v24 = vpop.eup %800  ;;  %v380_v35 = vsub.f32 1.0, %v1215_v49 }
  0x8a   : > { %v498_v25 = vmul.f32 %v494_v14, %v490_v8  ;;  %v422_v33 = vmul.f32 0.6931472, %v801_v24  ;;  %v432_v39 = vsub.f32 1.0, %v1223_v56  ;;  %v376_v41 = vsel %vm348_vm9, 0.75, %v956_v43 }
  0x8b   : > { %v509_v20 = vsub.f32 0.0, %v501_v10  ;;  %v803_v29 = vpop.eup %802  ;;  %v446_v17 = vadd.f32 %v442_v22, %v390_v11  ;;  %v387_v30 = vmul.f32 %v375_v57, %v370_v23  ;;  %v428_v48 = vsel %vm400_vm10, 0.75, %v956_v43 }
  0x8c   : > { %v478_v34 = vmul.f32 0.6931472, %v803_v29  ;;  %v439_v38 = vmul.f32 %v427_v61, %v422_v33  ;;  %v384_v50 = vmul.f32 %v380_v35, %v380_v35  ;;  %v436_v56 = vmul.f32 %v432_v39, %v432_v39 }
  0x8d   : > { %517 = vst [vmem:[%s1249_s28] sm:$0xff] %v509_v20  ;;  %v502_v36 = vadd.f32 %v498_v25, %v446_v17  ;;  %v391_v37 = vmul.f32 %v387_v30, %v383_v15  ;;  %v488_v59 = vsub.f32 1.0, %v472_v18  ;;  %v484_v63 = vsel %vm456_vm11, 0.75, %v956_v43 }
  0x8e   : > { %v805_v31 = vpop.eup %804  ;;  %v495_v40 = vmul.f32 %v483_v28, %v478_v34  ;;  %v443_v46 = vmul.f32 %v439_v38, %v435_v26 }
  0x8f   : > { %v807_v42 = vpop.eup %806  ;;  %v510_v45 = vsub.f32 0.0, %v502_v36  ;;  %v372_v47 = vmul.f32 0.6931472, %v805_v31  ;;  %v492_v1 = vmul.f32 %v488_v59, %v488_v59 }
  0x90   : > { %v499_v49 = vmul.f32 %v495_v40, %v491_v19  ;;  %v424_v51 = vmul.f32 0.6931472, %v807_v42  ;;  %v447_v53 = vadd.f32 %v443_v46, %v391_v37 }
  0x91   : > { %v388_v55 = vmul.f32 %v376_v41, %v372_v47  ;;  %518 = vst [vmem:[%s1249_s28 + $0x8] sm:$0xff] %v510_v45 }
  0x92   : > { %v440_v58 = vmul.f32 %v428_v48, %v424_v51  ;;  %v503_v44 = vadd.f32 %v499_v49, %v447_v53 }
  0x93   : > { %v392_v62 = vmul.f32 %v388_v55, %v384_v50 }
  0x94   : > { %v511_v60 = vsub.f32 0.0, %v503_v44  ;;  %v444_v21 = vmul.f32 %v440_v58, %v436_v56  ;;  %v809_v52 = vpop.eup %808 }
  0x95   : > { %v480_v0 = vmul.f32 0.6931472, %v809_v52 }
  0x96   : > { %519 = vst [vmem:[%s1249_s28 + $0x10] sm:$0xff] %v511_v60  ;;  %v448_v2 = vadd.f32 %v444_v21, %v392_v62 }
  0x97   : > { %v496_v3 = vmul.f32 %v484_v63, %v480_v0 }
  0x99   : > { %v500_v4 = vmul.f32 %v496_v3, %v492_v1 }
  0x9b   : > { %v504_v54 = vadd.f32 %v500_v4, %v448_v2 }
  0x9d   : > { %v512_v5 = vsub.f32 0.0, %v504_v54 }
  0x9f   : > { %520 = vst [vmem:[%s1249_s28 + $0x18] sm:$0xff] %v512_v5 }
  0xa0   : > { %879 = shalt.err (!%p876_p7)
}
  0xa1   : > { %s880_s18 = scalar_lea.hbm %s1269_s15, 512  ;;  %s884_s5 = scalar_lea.hbm %s1322_s2, 1024 }
  0xa2   : > { %p881_p1 = scmp.ne.s32.totalorder %s1269_s15, %s880_s18  ;;  %p885_p3 = scmp.lt.s32.totalorder %s1269_s15, %s1322_s2 }
  0xa3   : > { %p886_p8 = scmp.lt.s32.totalorder %s884_s5, %s880_s18 }
  0xa4   : > { %p882_p10 = pnand %p881_p1, %p1026_p9 }
  0xa5   : > { %p887_p0 = por %p886_p8, %p885_p3 }
  0xa6   : > { %p883_p13 = pneg %p882_p10 }
  0xa8   : > { %p888_p2 = pnand %p887_p0, %p883_p13 }
  0xaa   : > { %891 = shalt.err (!%p888_p2)
}
  0xab   : > { %s958_s21 = smov 128   ;;  %s959_s28 = smov 8  }
  0xac   : > { %677 = dma.vmem_to_hbm [thread:$0]  (%p1026_p9), %s1271_s3, 512, %s1269_s15, %s522_s16, %s958_s21, %s958_s21, %s959_s28  }
  0xad PF: > { %s552_s29 = sand.u32 1, %s930_s9   ;;  %p687_p5 = pnand %p656_p12, %p1033_p11 }
  0xae   : > { %s553_s7 = scalar_lea.sflag [#allocation4], %s552_s29 }
  0xaf   : > { %p688_p6 = pneg %p687_p5 }
  0xb1   : > { %925 = dma.done.wait (%p688_p6), %s553_s7, 512  }
  0xb2   : > { %927 = vsyncadd (%p688_p6), %s553_s7, 4294966784  ;;  %s21_s14 = sadd.s32 1, %s950_s14   ;;  %s1329_s9 = smov %s934_s10 }
  0xb3   : > { %p18_p4 = scmp.ge.s32.totalorder %s21_s14, 4   ;;  %s1330_s10 = smov %s938_s11 }
  0xb4   : > { %s1331_s11 = smov %s1031_s23  ;;  %s1332_s12 = smov %s946_s13 }
  0xb5   : > { %s1333_s13 = smov %s1335_s17  ;;  %20 = sbr.rel (!%p18_p4) target bundleno = 8 (0x8), region = 90 }
  0xba   :  { %558 = vsyncpa [#allocation3], 1 }
  0xbb   :  { %560 = vsyncpa [#allocation3 + $0x1], 1 }
  0xbc   :  { %561 = vsyncpa [#allocation6], 1 }
  0xbd   :  { %563 = vsyncpa [#allocation6 + $0x1], 1 }
  0xbe   :  { %564 = vsyncpa [#allocation4], 1 }
  0xbf   :  { %566 = vsyncpa [#allocation4 + $0x1], 1 }

</bundles_post_ra>
